<compile_context>
chip_gen: v7x
topology: tpu7x:2x2x1
jax: 0.10.0
libtpu: 0.0.40
codegen_flags: <defaults>
</compile_context>

<pallas_src>
import inspect

import jax
import jax.numpy as jnp
from jax.experimental import pallas as pl
from jax.experimental.pallas import tpu as pltpu

_SUBLANE = 8              # sublane quantum: row tile / row padding granularity
_DEFAULT_ROW_TILE = 1024  # large tiles amortize the ~0.35us per-grid-step overhead


def _round_up(v, m):
    return -(-v // m) * m


def _cdiv(a, b):
    return -(-a // b)


def _vmem_capacity_bytes():
    """Per-TensorCore VMEM capacity; conservative (v7x) default if unknown."""
    try:
        return int(pltpu.get_tpu_info().vmem_capacity_bytes)
    except Exception:
        return 64 << 20


def _vmem_estimate(row_tile, in_dim, out_dim, itemsize, single_buffer_weights):
    wbuf = 1 if single_buffer_weights else 2
    weights = wbuf * (in_dim * in_dim + in_dim * out_dim + in_dim + out_dim) * itemsize
    x_io = 2 * row_tile * in_dim * itemsize        # double-buffered input tile
    out_io = 2 * row_tile * out_dim * itemsize     # double-buffered output tile
    hidden = row_tile * in_dim * 4                 # f32 hidden activation between the dots
    return weights + x_io + out_io + hidden


def _mlp_kernel(x_ref, w1_ref, b1_ref, w2_ref, b2_ref, o_ref):
    # hidden = relu(x @ W1 + b1); MXU accumulation in f32.
    h = jnp.dot(x_ref[...], w1_ref[...], preferred_element_type=jnp.float32)
    h = jnp.maximum(h + b1_ref[...].astype(jnp.float32), 0.0)
    # F.dropout(p, training=False) == identity (eval-mode forward).
    # TODO(synk): training-mode dropout would need pltpu.prng_seed/prng_random_bits.
    out = jnp.dot(h, w2_ref[...], preferred_element_type=jnp.float32)
    o_ref[...] = (out + b2_ref[...].astype(jnp.float32)).astype(o_ref.dtype)


_BLOCKSPEC_HAS_PIPELINE_MODE = (
    hasattr(pl, "Buffered")
    and "pipeline_mode" in inspect.signature(pl.BlockSpec).parameters
)


def _forward(x2d, w1, b1, w2, b2, row_tile, out_dtype, single_buffer_weights,
             vmem_limit):
    n_pad, in_dim = x2d.shape
    out_dim = w2.shape[1]
    grid = (_cdiv(n_pad, row_tile),)

    const_kw = {}
    if single_buffer_weights:
        # Constant-index operands never change across the grid: single-buffer
        # them so they don't pay for a pointless double buffer in VMEM.
        const_kw = dict(pipeline_mode=pl.Buffered(1))

    in_specs = [
        pl.BlockSpec((row_tile, in_dim), lambda i: (i, 0)),              # x row tile
        pl.BlockSpec((in_dim, in_dim), lambda i: (0, 0), **const_kw),    # W1 (resident)
        pl.BlockSpec((1, in_dim), lambda i: (0, 0), **const_kw),         # b1
        pl.BlockSpec((in_dim, out_dim), lambda i: (0, 0), **const_kw),   # W2 (resident)
        pl.BlockSpec((1, out_dim), lambda i: (0, 0), **const_kw),        # b2
    ]
    out_spec = pl.BlockSpec((row_tile, out_dim), lambda i: (i, 0))

    flops = 2 * n_pad * in_dim * (in_dim + out_dim)
    bytes_accessed = int(
        x2d.size * x2d.dtype.itemsize
        + w1.size * w1.dtype.itemsize + b1.size * b1.dtype.itemsize
        + w2.size * w2.dtype.itemsize + b2.size * b2.dtype.itemsize
        + n_pad * out_dim * jnp.dtype(out_dtype).itemsize)

    return pl.pallas_call(
        _mlp_kernel,
        out_shape=jax.ShapeDtypeStruct((n_pad, out_dim), out_dtype),
        grid_spec=pltpu.PrefetchScalarGridSpec(
            num_scalar_prefetch=0,
            grid=grid,
            in_specs=in_specs,
            out_specs=out_spec,
        ),
        compiler_params=pltpu.CompilerParams(
            dimension_semantics=("parallel",),  # rows shard across TCs (megacore / v7x)
            vmem_limit_bytes=vmem_limit,
        ),
        cost_estimate=pl.CostEstimate(
            flops=flops, transcendentals=0, bytes_accessed=bytes_accessed),
    )(x2d, w1, b1, w2, b2)


def event_discrete_decoder_layer(x, w1, b1, w2, b2, *, row_tile=None):
    """Fused eval-mode forward of EventDiscreteDecoderLayer (num_layers=2).

    x : (..., in_dim)            w1: (in_dim, in_dim)   (x @ W layout, i.e.
    b1: (1, in_dim) or (in_dim,)     PyTorch weight transposed)
    w2: (in_dim, out_dim)        b2: (1, out_dim) or (out_dim,)
    returns (..., out_dim) in x.dtype
    """
    in_dim = x.shape[-1]
    out_dim = w2.shape[-1]
    lead = x.shape[:-1]
    out_dtype = x.dtype

    # Keep native dtypes end-to-end: no wrapper-side upcast / feature padding.
    x2d = jnp.asarray(x).reshape(-1, in_dim)
    w1 = jnp.asarray(w1)
    w2 = jnp.asarray(w2)
    b1 = jnp.asarray(b1).reshape(1, in_dim)
    b2 = jnp.asarray(b2).reshape(1, out_dim)
    n = x2d.shape[0]

    # Rows padded only to the sublane quantum; the grid handles a partial
    # trailing block, so at most 7 padded rows ever exist.
    n_pad = _round_up(max(n, 1), _SUBLANE)
    if n_pad != n:
        x2d = jnp.pad(x2d, ((0, n_pad - n), (0, 0)))

    capacity = _vmem_capacity_bytes()
    budget = int(capacity * 0.6)       # row-tile shrink threshold
    limit_cap = int(capacity * 0.8)    # never request more than this from Mosaic

    single_buffer_weights = _BLOCKSPEC_HAS_PIPELINE_MODE

    if row_tile is None:
        if n_pad > _DEFAULT_ROW_TILE:
            # Many rows: large tiles, but keep >= ~4 grid steps for pipelining
            # and TensorCore sharding.
            row_tile = min(_DEFAULT_ROW_TILE, _round_up(_cdiv(n_pad, 4), _SUBLANE))
        elif n_pad >= 2 * 128:
            # Moderate row count: at least 2 steps so ("parallel",) can use
            # both TensorCores.
            row_tile = _round_up(_cdiv(n_pad, 2), _SUBLANE)
        else:
            row_tile = n_pad
        while (row_tile > _SUBLANE and
               _vmem_estimate(row_tile, in_dim, out_dim, 4,
                              single_buffer_weights) > budget):
            row_tile = max(_SUBLANE, _round_up(row_tile // 2, _SUBLANE))
    elif row_tile % _SUBLANE != 0:
        raise ValueError(
            f"row_tile must be a multiple of {_SUBLANE} (got {row_tile}) to "
            "satisfy the TPU (8, 128) block constraint")
    row_tile = max(_SUBLANE, min(row_tile, n_pad))

    # TODO(synk): for very large in_dim the resident W1 (in_dim^2 elements) alone
    # can exceed v7x's 64 MiB VMEM; that regime needs a K-tiled grid axis with an
    # f32 accumulator (pl.when init/finalize) and/or bf16 weights.

    est = _vmem_estimate(row_tile, in_dim, out_dim, 4, single_buffer_weights)
    vmem_limit = int(min(limit_cap, max(32 << 20, 2 * est)))

    if single_buffer_weights:
        try:
            out_p = _forward(x2d, w1, b1, w2, b2, row_tile, out_dtype,
                             True, vmem_limit)
        except (TypeError, ValueError, NotImplementedError,
                pltpu.LoweringException):
            # Buffered(1) rejected by this jax build: fall back to default
            # (double-buffered) weight blocks with a consistent VMEM estimate.
            est = _vmem_estimate(row_tile, in_dim, out_dim, 4, False)
            vmem_limit = int(min(limit_cap, max(32 << 20, 2 * est)))
            out_p = _forward(x2d, w1, b1, w2, b2, row_tile, out_dtype,
                             False, vmem_limit)
    else:
        out_p = _forward(x2d, w1, b1, w2, b2, row_tile, out_dtype,
                         False, vmem_limit)

    out = out_p[:n] if n_pad != n else out_p
    return out.reshape(*lead, out_dim)


def init_params(key, in_dim, out_dim):
    """Deterministic PyTorch-Linear-style init (uniform +/- 1/sqrt(fan_in))."""
    k1, k2, k3, k4 = jax.random.split(key, 4)
    bound = 1.0 / (in_dim ** 0.5)
    w1 = jax.random.uniform(k1, (in_dim, in_dim), jnp.float32, -bound, bound)
    b1 = jax.random.uniform(k2, (1, in_dim), jnp.float32, -bound, bound)
    w2 = jax.random.uniform(k3, (in_dim, out_dim), jnp.float32, -bound, bound)
    b2 = jax.random.uniform(k4, (1, out_dim), jnp.float32, -bound, bound)
    return w1, b1, w2, b2


if __name__ == "__main__":
    key = jax.random.PRNGKey(0)
    kx, kp = jax.random.split(key)

    # Small shapes consistent with the module (single decoder layer, eval mode).
    N, in_dim, out_dim = 8, 32, 16
    x = jax.random.normal(kx, (N, in_dim), jnp.float32)
    w1, b1, w2, b2 = init_params(kp, in_dim, out_dim)

    out = event_discrete_decoder_layer(x, w1, b1, w2, b2)
    out = jax.block_until_ready(out)

    # pure-JAX reference check
    ref = jnp.maximum(x @ w1 + b1, 0.0) @ w2 + b2
    assert out.shape == (N, out_dim)
    assert jnp.allclose(out, ref, atol=1e-5, rtol=1e-5)

    # Larger batch: exercises the multi-step pipelined grid and a partial
    # trailing row block (1000 rows, 2 grid steps).
    N2 = 1000
    x2 = jax.random.normal(kx, (N2, in_dim), jnp.float32)
    out2 = jax.block_until_ready(event_discrete_decoder_layer(x2, w1, b1, w2, b2))
    ref2 = jnp.maximum(x2 @ w1 + b1, 0.0) @ w2 + b2
    assert out2.shape == (N2, out_dim)
    assert jnp.allclose(out2, ref2, atol=1e-4, rtol=1e-4)

    print("KERNEL_OK")
</pallas_src>

<mosaic_0001>
module attributes {stable_mosaic.version = 11 : i64} {
  func.func @_mlp_kernel(%arg0: i32, %arg1: memref<8x32xf32, #tpu.memory_space<vmem>>, %arg2: memref<32x32xf32, #tpu.memory_space<vmem>>, %arg3: memref<1x32xf32, #tpu.memory_space<vmem>>, %arg4: memref<32x16xf32, #tpu.memory_space<vmem>>, %arg5: memref<1x16xf32, #tpu.memory_space<vmem>>, %arg6: memref<8x16xf32, #tpu.memory_space<vmem>>) attributes {dimension_semantics = [#tpu.dimension_semantics<parallel>], iteration_bounds = array<i64: 1>, scalar_prefetch = 0 : i64, scratch_operands = 0 : i64, tpu.core_type = #tpu.core_type<tc>, window_params = [{transform_indices = @transform_0, window_bounds = array<i64: 8, 32>}, {pipeline_mode = #tpu.pipeline_mode<synchronous>, transform_indices = @transform_1, window_bounds = array<i64: 32, 32>}, {pipeline_mode = #tpu.pipeline_mode<synchronous>, transform_indices = @transform_2, window_bounds = array<i64: 1, 32>}, {pipeline_mode = #tpu.pipeline_mode<synchronous>, transform_indices = @transform_3, window_bounds = array<i64: 32, 16>}, {pipeline_mode = #tpu.pipeline_mode<synchronous>, transform_indices = @transform_4, window_bounds = array<i64: 1, 16>}, {transform_indices = @transform_5, window_bounds = array<i64: 8, 16>}]} {
    %c0 = arith.constant 0 : index
    %c0_0 = arith.constant 0 : index
    %0 = vector.load %arg1[%c0, %c0_0] : memref<8x32xf32, #tpu.memory_space<vmem>>, vector<8x32xf32>
    %c0_1 = arith.constant 0 : index
    %c0_2 = arith.constant 0 : index
    %1 = vector.load %arg2[%c0_1, %c0_2] : memref<32x32xf32, #tpu.memory_space<vmem>>, vector<32x32xf32>
    %cst = arith.constant dense<0.000000e+00> : vector<8x32xf32>
    %2 = tpu.matmul %0, %1, %cst {dimension_numbers = #tpu.dot_dimension_numbers<[1], [0], [0], [1], [0, 0, 1, 1], [], []>} : vector<8x32xf32>, vector<32x32xf32>, vector<8x32xf32> -> vector<8x32xf32>
    %c0_3 = arith.constant 0 : index
    %c0_4 = arith.constant 0 : index
    %3 = vector.load %arg3[%c0_3, %c0_4] : memref<1x32xf32, #tpu.memory_space<vmem>>, vector<1x32xf32>
    %4 = vector.broadcast %3 : vector<1x32xf32> to vector<8x32xf32>
    %5 = arith.addf %2, %4 : vector<8x32xf32>
    %cst_5 = arith.constant 0.000000e+00 : f32
    %6 = vector.broadcast %cst_5 : f32 to vector<8x32xf32>
    %7 = arith.maximumf %5, %6 : vector<8x32xf32>
    %c0_6 = arith.constant 0 : index
    %c0_7 = arith.constant 0 : index
    %8 = vector.load %arg4[%c0_6, %c0_7] : memref<32x16xf32, #tpu.memory_space<vmem>>, vector<32x16xf32>
    %cst_8 = arith.constant dense<0.000000e+00> : vector<8x16xf32>
    %9 = tpu.matmul %7, %8, %cst_8 {dimension_numbers = #tpu.dot_dimension_numbers<[1], [0], [0], [1], [0, 0, 1, 1], [], []>} : vector<8x32xf32>, vector<32x16xf32>, vector<8x16xf32> -> vector<8x16xf32>
    %c0_9 = arith.constant 0 : index
    %c0_10 = arith.constant 0 : index
    %10 = vector.load %arg5[%c0_9, %c0_10] : memref<1x16xf32, #tpu.memory_space<vmem>>, vector<1x16xf32>
    %11 = vector.broadcast %10 : vector<1x16xf32> to vector<8x16xf32>
    %12 = arith.addf %9, %11 : vector<8x16xf32>
    %c0_11 = arith.constant 0 : index
    %c0_12 = arith.constant 0 : index
    %13 = vector.load %arg6[%c0_11, %c0_12] : memref<8x16xf32, #tpu.memory_space<vmem>>, vector<8x16xf32>
    tpu.vector_store %arg6[%c0_11, %c0_12], %12 {strides = array<i32>} : memref<8x16xf32, #tpu.memory_space<vmem>>, vector<8x16xf32>,
    return
  }
  func.func @transform_0(%arg0: i32) -> (i32, i32) {
    %c0_i32 = arith.constant 0 : i32
    %c0_i32_0 = arith.constant 0 : i32
    return %arg0, %c0_i32 : i32, i32
  }
  func.func @transform_1(%arg0: i32) -> (i32, i32) {
    %c0_i32 = arith.constant 0 : i32
    %c0_i32_0 = arith.constant 0 : i32
    %c0_i32_1 = arith.constant 0 : i32
    return %c0_i32, %c0_i32_0 : i32, i32
  }
  func.func @transform_2(%arg0: i32) -> (i32, i32) {
    %c0_i32 = arith.constant 0 : i32
    %c0_i32_0 = arith.constant 0 : i32
    %c0_i32_1 = arith.constant 0 : i32
    return %c0_i32, %c0_i32_0 : i32, i32
  }
  func.func @transform_3(%arg0: i32) -> (i32, i32) {
    %c0_i32 = arith.constant 0 : i32
    %c0_i32_0 = arith.constant 0 : i32
    %c0_i32_1 = arith.constant 0 : i32
    return %c0_i32, %c0_i32_0 : i32, i32
  }
  func.func @transform_4(%arg0: i32) -> (i32, i32) {
    %c0_i32 = arith.constant 0 : i32
    %c0_i32_0 = arith.constant 0 : i32
    %c0_i32_1 = arith.constant 0 : i32
    return %c0_i32, %c0_i32_0 : i32, i32
  }
  func.func @transform_5(%arg0: i32) -> (i32, i32) {
    %c0_i32 = arith.constant 0 : i32
    %c0_i32_0 = arith.constant 0 : i32
    return %arg0, %c0_i32 : i32, i32
  }
}

</mosaic_0001>

<bundles_post_ra>
// kernel: tpu_custom_call.1
= control target key start
LH: loop header
LB: loop body
LE: loop exit
PB: predicated region body
PF: predicated region fallthrough
CT: control target
= control target key end

     0   :  { %v284_v3 = vmov 0.0|0.0   ;;  %vm285_vm0 = vmmov 0   ;;  %v286_v6 = vmov 0.0   ;;  %s363_s0 = inlined_call_operand.vmem [shape: f32[8,32], index: 0, kind: input, shape index: {}]   ;;  %s364_s1 = inlined_call_operand.vmem [shape: f32[32,32], index: 1, kind: input, shape index: {}]   ;;  %s365_s2 = inlined_call_operand.vmem [shape: f32[1,32], index: 2, kind: input, shape index: {}]   ;;  %s366_s3 = inlined_call_operand.vmem [shape: f32[32,16], index: 3, kind: input, shape index: {}]   ;;  %s367_s4 = inlined_call_operand.vmem [shape: f32[1,16], index: 4, kind: input, shape index: {}]   ;;  %s368_s5 = inlined_call_operand.hbm [shape: f32[8,16], index: 5, kind: output, shape index: {}]  }
   0x1   :  { %v22_v0 = vld [vmem:[%s364_s1] sm:$0xff]  ;;  %v23_v1 = vld [vmem:[%s364_s1 + $0x8] sm:$0xff]  ;;  %v24_v2 = vld [vmem:[%s364_s1 + $0x10] sm:$0xff]  ;;  %244 = vmatprep.subr.bf16.mxu0 %v284_v3  ;;  %230 = vmatprep.mubr.msk.f32.mxu0 %vm285_vm0, %v286_v6 }
   0x2   :  { %v245_v4 = vpack.c.bf16 %v23_v1, %v22_v0  ;;  %v25_v5 = vld [vmem:[%s364_s1 + $0x18] sm:$0xff]  ;;  %v108_v7 = vld [vmem:[%s366_s3] sm:$0xff]  ;;  %250 = vmatprep.subr.bf16.mxu1 %v284_v3  ;;  %v109_v8 = vld [vmem:[%s366_s3 + $0x8] sm:$0xff]  ;;  %241 = vmatprep.mubr.msk.f32.mxu1 %vm285_vm0, %v286_v6 }
   0x3   :  { %10 = vsyncpa [#allocation3], 0  ;;  %v248_v9 = vpack.c.bf16 %v25_v5, %v24_v2  ;;  %v251_v10 = vpack.c.bf16 %v109_v8, %v108_v7  ;;  %v21_v11 = vld [vmem:[%s363_s0] sm:$0xff]  ;;  %vm33_vm1 = vcmask 261120   ;;  %v110_v12 = vld [vmem:[%s366_s3 + $0x10] sm:$0xff]  ;;  %s287_s13 = smov [#allocation2]  }
   0x4   :  { %246 = vmatpush3.bf16.msra.mxu0 %v245_v4  ;;  %v111_v13 = vld [vmem:[%s366_s3 + $0x18] sm:$0xff]  ;;  %v208_v15 = vld [vmem:[%s365_s2] ss:$0 sm:$0xff]  ;;  %s200_s14 = sshll.u32 %s287_s13, 4  ;;  %vm192_vm2 = vcmask 130048   ;;  %s201_s14 = int_to_ptr.vmem [resolvable:$true] %s200_s14 }
   0x5   :  { %247 = vmatprep.subr.bf16.mxu0 %v284_v3  ;;  %252 = vmatpush3.bf16.msra.mxu1 %v251_v10  ;;  %v254_v14 = vpack.c.bf16 %v111_v13, %v110_v12  ;;  %v210_v20 = vld [vmem:[%s367_s4] ss:$0 sm:$0xff]  ;;  %s260_s3 = scalar_lea.vmem %s201_s14, 128  ;;  %p265_p1 = scmp.lt.s32.totalorder %s201_s14, %s201_s14 }
   0x6   :  { %253 = vmatprep.subr.bf16.mxu1 %v284_v3  ;;  %p261_p0 = scmp.ne.s32.totalorder %s201_s14, %s260_s3  ;;  %p266_p2 = scmp.lt.s32.totalorder %s260_s3, %s260_s3 }
   0x8   :  { %249 = vmatpush3.bf16.msra.mxu0 %v248_v9  ;;  %p267_p3 = por %p266_p2, %p265_p1 }
   0x9   :  { %255 = vmatpush3.bf16.msra.mxu1 %v254_v14 }
   0xa   :  { %p268_p4 = pnand %p267_p3, %p261_p0 }
   0xb   :  { %231 = vmatmul.mubr.msk.f32.vlgmr.msra.gmra.mrb[0].mxu0 %vm33_vm1, %v21_v11 }
  0xde   :  { %v103_v16 = vpop.f32.mrb[0].mxu0 }
  0xdf   :  { %v104_v17 = vadd.f32 %v208_v15, %v103_v16  ;;  %v232_v18 = vpop.f32.mrb[1].mxu0 }
  0xe1   :  { %v107_v19 = vmax.f32 %v104_v17, 0.0 }
  0xe3   :  { %242 = vmatmul.mubr.msk.f32.vlgmr.msra.gmra.mrb[0].mxu1 %vm33_vm1, %v107_v19 }
 0x1b6   :  { %v188_v21 = vpop.f32.mrb[0].mxu1 }
 0x1b7   :  { %v189_v22 = vadd.f32 %v210_v20, %v188_v21  ;;  %v243_v23 = vpop.f32.mrb[1].mxu1 }
 0x1b9   :  { %193 = vst.msk [vmem:[#allocation2] sm:$0xff] %vm192_vm2, %v189_v22 }
 0x1ba   :  { %271 = shalt.err (!%p268_p4)
}
 0x1bb   :  { %s272_s16 = scalar_lea.hbm %s368_s5, 128 }
 0x1bc   :  { %p273_p5 = scmp.ne.s32.totalorder %s368_s5, %s272_s16  ;;  %p276_p6 = scmp.lt.u32.totalorder %s272_s16, %s368_s5 }
 0x1be   :  { %p278_p7 = pnand %p276_p6, %p273_p5 }
 0x1c0   :  { %281 = shalt.err (!%p278_p7)
}
 0x1c1   :  { %203 = dma.vmem_to_hbm [thread:$0]  %s201_s14, 128, %s368_s5, [#allocation3]  }
 0x1c2   :  { %282 = dma.done.wait [#allocation3], 128  }
 0x1c3   :  { %283 = vsyncadd [#allocation3], 4294967168 }
 0x1c4   :  { %207 = vsyncpa [#allocation3], 1 }

</bundles_post_ra>
